<compile_context>
chip_gen: v6e
topology: v6e:2x2x1
jax: 0.10.0
libtpu: 0.0.40
codegen_flags: <defaults>
</compile_context>

<pallas_src>
import functools

import numpy as np
import jax
import jax.numpy as jnp
from jax.experimental import pallas as pl
from jax.experimental.pallas import tpu as pltpu

LANE = 128  # TPU lane width; channel/class dims are padded to this.


def _textcnn_kernel(emb_ref, w_ref, meta_ref, fcw_ref, fcb_ref, out_ref,
                    *, B, L, k_max, c_pad):
    """Fused conv (single im2col matmul) + ReLU + masked global max-pool + FC."""
    BL = B * L

    # --- im2col: build the unfolded activation slab once. -------------------
    # emb_ref is (B*L + k_max - 1, H) f32, zero-padded at the tail, so every static
    # slice stays in bounds.  Rows that "bleed" past a sequence end only ever meet
    # zero-padded weight taps or positions that get masked before the max-pool.
    cols = [emb_ref[pl.ds(dk, BL), :] for dk in range(k_max)]
    xu = jnp.concatenate(cols, axis=1).astype(jnp.bfloat16)       # (BL, k_max*H)

    # --- all conv branches as ONE MXU matmul (bf16 in, f32 accumulate). -----
    acc = jnp.dot(xu, w_ref[...], preferred_element_type=jnp.float32)  # (BL, c_pad)

    bias = meta_ref[0:1, :]                                        # (1, c_pad) f32
    s = jnp.maximum(acc + bias, 0.0)                               # ReLU(conv + b)
    s = s.reshape(B, L, c_pad)

    # --- mask invalid time positions per merged channel, then max-pool. -----
    # Post-ReLU values are >= 0, so a 0-mask is exactly equivalent to a -inf mask.
    t_pos = jax.lax.broadcasted_iota(jnp.int32, (B, L, c_pad), 1)
    t_valid = meta_ref[1:2, :].astype(jnp.int32).reshape(1, 1, c_pad)
    s = jnp.where(t_pos < t_valid, s, 0.0)
    pooled = jnp.max(s, axis=1)                                    # (B, c_pad) f32

    # --- dropout(eval)=identity; final FC on the lane-dense feature slab. ---
    logits = jnp.dot(pooled, fcw_ref[...],
                     preferred_element_type=jnp.float32) + fcb_ref[...]
    out_ref[...] = logits                                          # (B, n_pad) lane-dense store


def pack_textcnn_params(conv_weights, conv_biases, fc_w, fc_b, seq_len):
    """Host-side packing: merge all conv branches into one im2col weight.

    conv_weights[i]: (C_i, 1, k_i, H)   (PyTorch Conv2d(1, C_i, (k_i, H)) layout)
    conv_biases[i]:  (C_i,)
    fc_w: (class_num, sum(C_i))         (PyTorch Linear layout)
    fc_b: (class_num,)
    """
    kernel_sizes = tuple(int(w.shape[2]) for w in conv_weights)
    filter_nums = tuple(int(w.shape[0]) for w in conv_weights)
    H = int(conv_weights[0].shape[3])
    k_max = max(kernel_sizes)
    f_total = sum(filter_nums)
    class_num = int(fc_w.shape[0])
    c_pad = max(LANE, ((f_total + LANE - 1) // LANE) * LANE)
    n_pad = max(LANE, ((class_num + LANE - 1) // LANE) * LANE)

    w_packed = np.zeros((k_max, H, c_pad), np.float32)
    bias_row = np.zeros((c_pad,), np.float32)
    valid_row = np.full((c_pad,), float(seq_len), np.float32)   # padded channels: harmless
    off = 0
    for w, b, k, c in zip(conv_weights, conv_biases, kernel_sizes, filter_nums):
        w_khc = np.transpose(np.asarray(w)[:, 0, :, :], (1, 2, 0))   # (k, H, C)
        w_packed[:k, :, off:off + c] = w_khc                          # taps >= k stay zero
        bias_row[off:off + c] = np.asarray(b)
        valid_row[off:off + c] = float(seq_len - k + 1)               # T_i valid time steps
        off += c

    w_packed = jnp.asarray(w_packed.reshape(k_max * H, c_pad), jnp.bfloat16)
    meta = jnp.asarray(np.stack([bias_row, valid_row], axis=0))       # (2, c_pad) f32

    fcw_p = np.zeros((c_pad, n_pad), np.float32)
    fcw_p[:f_total, :class_num] = np.asarray(fc_w).T
    fcb_p = np.zeros((1, n_pad), np.float32)
    fcb_p[0, :class_num] = np.asarray(fc_b)
    return (w_packed, meta, jnp.asarray(fcw_p), jnp.asarray(fcb_p),
            {"k_max": k_max, "class_num": class_num})


@functools.partial(jax.jit, static_argnames=("k_max", "class_num"))
def textcnn_forward(token_ids, embedding_table, w_packed, meta, fcw_p, fcb_p,
                    *, k_max, class_num):
    B, L = token_ids.shape
    c_pad = w_packed.shape[1]
    n_pad = fcw_p.shape[1]

    # TODO(synk): at realistic batch/seq sizes, fuse this gather into the kernel via a
    # scalar-prefetch row gather; at B=2, L=16 the XLA gather is cheaper than a
    # per-row Pallas grid (each grid step costs ~0.35 us).
    emb = jnp.take(embedding_table, token_ids.reshape(-1), axis=0)    # (B*L, H) f32
    emb = jnp.pad(emb, ((0, k_max - 1), (0, 0)))                      # tail zeros for im2col

    kernel = functools.partial(_textcnn_kernel, B=B, L=L, k_max=k_max, c_pad=c_pad)
    vmem = pl.BlockSpec(memory_space=pltpu.MemorySpace.VMEM)

    logits_padded = pl.pallas_call(
        kernel,
        out_shape=jax.ShapeDtypeStruct((B, n_pad), jnp.float32),
        in_specs=[vmem] * 5,
        out_specs=vmem,
        # NOTE: no grid at these shapes (a grid is a serial loop + per-step overhead).
        # At large B, add a 'parallel' batch grid axis (v7x: 2 TCs/chip) and size
        # blocks to stay under the 64 MiB v7x VMEM (vs 128 MiB on v5e/v6e).
    )(emb, w_packed, meta, fcw_p, fcb_p)
    return logits_padded[:, :class_num]


def textcnn_reference(token_ids, embedding_table, conv_weights, conv_biases, fc_w, fc_b):
    """Pure-JAX f32 reference matching the PyTorch forward."""
    B, L = token_ids.shape
    H = embedding_table.shape[1]
    emb = jnp.take(embedding_table, token_ids.reshape(-1), axis=0).reshape(B, L, H)
    feats = []
    for w, b in zip(conv_weights, conv_biases):
        c, _, k, _ = w.shape
        T = L - k + 1
        w2 = w.reshape(c, k * H)
        outs = []
        for t in range(T):
            window = emb[:, t:t + k, :].reshape(B, k * H)
            outs.append(window @ w2.T + b)
        s = jnp.maximum(jnp.stack(outs, axis=1), 0.0)       # (B, T, c)
        feats.append(jnp.max(s, axis=1))                    # (B, c)
    x = jnp.concatenate(feats, axis=1)
    return x @ fc_w.T + fc_b


if __name__ == "__main__":
    # Small config consistent with TextCnn.__init__ / forward.
    vocab_size = 50
    hidden_dim = 32          # config.hidden_dim
    filter_num = (8, 8, 8)   # config.filter_num
    kernel_size = (3, 4, 5)  # config.kernel_size
    class_num = 4            # config.class_num
    B, L = 2, 16             # batch, sequence length

    key = jax.random.PRNGKey(0)
    keys = jax.random.split(key, 2 + 2 * len(filter_num) + 2)

    embedding_table = jax.random.normal(keys[0], (vocab_size, hidden_dim), jnp.float32) * 0.1
    token_ids = jax.random.randint(keys[1], (B, L), 0, vocab_size)

    conv_weights, conv_biases = [], []
    for i, (c, k) in enumerate(zip(filter_num, kernel_size)):
        # PyTorch Conv2d(1, c, (k, H)) weight layout: (c, 1, k, H); bias: (c,)
        w = jax.random.normal(keys[2 + 2 * i], (c, 1, k, hidden_dim), jnp.float32) * 0.1
        b = jax.random.normal(keys[3 + 2 * i], (c,), jnp.float32) * 0.1
        conv_weights.append(w)
        conv_biases.append(b)

    f_total = sum(filter_num)
    # PyTorch Linear layout: weight (class_num, F_total), bias (class_num,)
    fc_w = jax.random.normal(keys[-2], (class_num, f_total), jnp.float32) * 0.1
    fc_b = jax.random.normal(keys[-1], (class_num,), jnp.float32) * 0.1

    w_packed, meta, fcw_p, fcb_p, info = pack_textcnn_params(
        conv_weights, conv_biases, fc_w, fc_b, seq_len=L)

    logits = textcnn_forward(token_ids, embedding_table, w_packed, meta, fcw_p, fcb_p,
                             k_max=info["k_max"], class_num=info["class_num"])
    logits = jax.block_until_ready(logits)
    assert logits.shape == (B, class_num)

    ref = textcnn_reference(token_ids, embedding_table, conv_weights, conv_biases, fc_w, fc_b)
    np.testing.assert_allclose(np.asarray(logits), np.asarray(ref), atol=2e-2, rtol=2e-2)

    print("KERNEL_OK")
</pallas_src>

<mosaic_0001>
module attributes {stable_mosaic.version = 11 : i64} {
  func.func @_textcnn_kernel(%arg0: memref<36x32xf32, #tpu.memory_space<vmem>>, %arg1: memref<160x128xbf16, #tpu.memory_space<vmem>>, %arg2: memref<2x128xf32, #tpu.memory_space<vmem>>, %arg3: memref<128x128xf32, #tpu.memory_space<vmem>>, %arg4: memref<1x128xf32, #tpu.memory_space<vmem>>, %arg5: memref<2x128xf32, #tpu.memory_space<vmem>>) attributes {dimension_semantics = [], scalar_prefetch = 0 : i64, scratch_operands = 0 : i64, tpu.core_type = #tpu.core_type<tc>} {
    %c0 = arith.constant 0 : index
    %c0_0 = arith.constant 0 : index
    %0 = vector.load %arg0[%c0, %c0_0] : memref<36x32xf32, #tpu.memory_space<vmem>>, vector<32x32xf32>
    %c1 = arith.constant 1 : index
    %c0_1 = arith.constant 0 : index
    %1 = vector.load %arg0[%c1, %c0_1] : memref<36x32xf32, #tpu.memory_space<vmem>>, vector<32x32xf32>
    %c2 = arith.constant 2 : index
    %c0_2 = arith.constant 0 : index
    %2 = vector.load %arg0[%c2, %c0_2] : memref<36x32xf32, #tpu.memory_space<vmem>>, vector<32x32xf32>
    %c3 = arith.constant 3 : index
    %c0_3 = arith.constant 0 : index
    %3 = vector.load %arg0[%c3, %c0_3] : memref<36x32xf32, #tpu.memory_space<vmem>>, vector<32x32xf32>
    %c4 = arith.constant 4 : index
    %c0_4 = arith.constant 0 : index
    %4 = vector.load %arg0[%c4, %c0_4] : memref<36x32xf32, #tpu.memory_space<vmem>>, vector<32x32xf32>
    %5 = tpu.concatenate %0, %1, %2, %3, %4 in 1 : vector<32x32xf32>, vector<32x32xf32>, vector<32x32xf32>, vector<32x32xf32>, vector<32x32xf32> -> vector<32x160xf32>
    %6 = arith.truncf %5 : vector<32x160xf32> to vector<32x160xbf16>
    %c0_5 = arith.constant 0 : index
    %c0_6 = arith.constant 0 : index
    %7 = vector.load %arg1[%c0_5, %c0_6] : memref<160x128xbf16, #tpu.memory_space<vmem>>, vector<160x128xbf16>
    %cst = arith.constant dense<0.000000e+00> : vector<32x128xf32>
    %8 = tpu.matmul %6, %7, %cst {dimension_numbers = #tpu.dot_dimension_numbers<[1], [0], [0], [1], [0, 0, 1, 1], [], []>} : vector<32x160xbf16>, vector<160x128xbf16>, vector<32x128xf32> -> vector<32x128xf32>
    %c0_7 = arith.constant 0 : index
    %c0_8 = arith.constant 0 : index
    %9 = vector.load %arg2[%c0_7, %c0_8] : memref<2x128xf32, #tpu.memory_space<vmem>>, vector<1x128xf32>
    %10 = vector.broadcast %9 : vector<1x128xf32> to vector<32x128xf32>
    %11 = arith.addf %8, %10 : vector<32x128xf32>
    %cst_9 = arith.constant 0.000000e+00 : f32
    %12 = vector.broadcast %cst_9 : f32 to vector<32x128xf32>
    %13 = arith.maximumf %11, %12 : vector<32x128xf32>
    %14 = vector.shape_cast %13 : vector<32x128xf32> to vector<2x16x128xf32>
    %15 = tpu.iota {dimensions = array<i32: 1>} : vector<2x16x128xi32>
    %c1_10 = arith.constant 1 : index
    %c0_11 = arith.constant 0 : index
    %16 = vector.load %arg2[%c1_10, %c0_11] : memref<2x128xf32, #tpu.memory_space<vmem>>, vector<1x128xf32>
    %17 = arith.fptosi %16 : vector<1x128xf32> to vector<1x128xi32>
    %18 = vector.shape_cast %17 : vector<1x128xi32> to vector<1x1x128xi32>
    %19 = vector.broadcast %18 : vector<1x1x128xi32> to vector<2x16x128xi32>
    %20 = arith.cmpi slt, %15, %19 : vector<2x16x128xi32>
    %cst_12 = arith.constant 0.000000e+00 : f32
    %21 = vector.broadcast %cst_12 : f32 to vector<2x16x128xf32>
    %22 = arith.select %20, %14, %21 : vector<2x16x128xi1>, vector<2x16x128xf32>
    %cst_13 = arith.constant dense<0xFF800000> : vector<2x128xf32>
    %23 = vector.multi_reduction <maximumf>, %22, %cst_13 [1] : vector<2x16x128xf32> to vector<2x128xf32>
    %c0_14 = arith.constant 0 : index
    %c0_15 = arith.constant 0 : index
    %24 = vector.load %arg3[%c0_14, %c0_15] : memref<128x128xf32, #tpu.memory_space<vmem>>, vector<128x128xf32>
    %cst_16 = arith.constant dense<0.000000e+00> : vector<2x128xf32>
    %25 = tpu.matmul %23, %24, %cst_16 {dimension_numbers = #tpu.dot_dimension_numbers<[1], [0], [0], [1], [0, 0, 1, 1], [], []>} : vector<2x128xf32>, vector<128x128xf32>, vector<2x128xf32> -> vector<2x128xf32>
    %c0_17 = arith.constant 0 : index
    %c0_18 = arith.constant 0 : index
    %26 = vector.load %arg4[%c0_17, %c0_18] : memref<1x128xf32, #tpu.memory_space<vmem>>, vector<1x128xf32>
    %27 = vector.broadcast %26 : vector<1x128xf32> to vector<2x128xf32>
    %28 = arith.addf %25, %27 : vector<2x128xf32>
    %c0_19 = arith.constant 0 : index
    %c0_20 = arith.constant 0 : index
    %29 = vector.load %arg5[%c0_19, %c0_20] : memref<2x128xf32, #tpu.memory_space<vmem>>, vector<2x128xf32>
    tpu.vector_store %arg5[%c0_19, %c0_20], %28 {strides = array<i32>} : memref<2x128xf32, #tpu.memory_space<vmem>>, vector<2x128xf32>,
    return
  }
}

</mosaic_0001>

<bundles_post_ra>
// kernel: textcnn_forward.1
= control target key start
LH: loop header
LB: loop body
LE: loop exit
PB: predicated region body
PF: predicated region fallthrough
CT: control target
= control target key end

     0   :  { %v532_v7 = vmov 0   ;;  %s533_s9 = smov 32   ;;  %s534_s16 = smov 96   ;;  %vm90_vm0 = vcmask 261120   ;;  %s737_s0 = inlined_call_operand.vmem [shape: f32[36,32], index: 0, kind: input, shape index: {}]   ;;  %s738_s1 = inlined_call_operand.vmem [shape: bf16[160,128], index: 1, kind: input, shape index: {}]   ;;  %s739_s2 = inlined_call_operand.vmem [shape: f32[2,128], index: 2, kind: input, shape index: {}]   ;;  %s740_s3 = inlined_call_operand.vmem [shape: f32[128,128], index: 3, kind: input, shape index: {}]   ;;  %s741_s4 = inlined_call_operand.vmem [shape: f32[1,128], index: 4, kind: input, shape index: {}]   ;;  %s742_s5 = inlined_call_operand.hbm [shape: f32[2,128], index: 5, kind: output, shape index: {}]  }
   0x1   :  { %v26_v0 = vld [vmem:[%s737_s0 + $0x1] sm:$0xff]  ;;  %v27_v1 = vld [vmem:[%s737_s0 + $0x9] sm:$0xff]  ;;  %200 = vmatprep.subr.bf16.mxu0 %v532_v7  ;;  %v28_v9 = vld [vmem:[%s737_s0 + $0x11] sm:$0xff]  ;;  %s535_s23 = smov 64  }
   0x2   :  { %v34_v2 = vld [vmem:[%s737_s0 + $0x3] sm:$0xff]  ;;  %v470_v3 = vpack.i.bf16 %v27_v1, %v26_v0  ;;  %v35_v4 = vld [vmem:[%s737_s0 + $0xb] sm:$0xff]  ;;  %v29_v10 = vld [vmem:[%s737_s0 + $0x19] sm:$0xff] }
   0x3   :  { %v30_v5 = vld [vmem:[%s737_s0 + $0x2] sm:$0xff]  ;;  %v31_v6 = vld [vmem:[%s737_s0 + $0xa] sm:$0xff]  ;;  %v480_v8 = vpack.i.bf16 %v35_v4, %v34_v2  ;;  %v32_v12 = vld [vmem:[%s737_s0 + $0x12] sm:$0xff]  ;;  %v485_v15 = vpack.i.bf16 %v29_v10, %v28_v9 }
   0x4   :  { %471 = vrot.lane.b32.xlu0 %v470_v3, %s533_s9  ;;  %v475_v11 = vpack.i.bf16 %v31_v6, %v30_v5  ;;  %v33_v13 = vld [vmem:[%s737_s0 + $0x1a] sm:$0xff]  ;;  %v501_v18 = vld [vmem:[%s738_s1 + $0x30] sm:$0xff]   ;;  %v502_v21 = vld [vmem:[%s738_s1 + $0x28] sm:$0xff]  }
   0x5   :  { %v36_v14 = vld [vmem:[%s737_s0 + $0x13] sm:$0xff]  ;;  %481 = vrot.lane.b32.xlu1 %v480_v8, %s534_s16  ;;  %v37_v17 = vld [vmem:[%s737_s0 + $0x1b] sm:$0xff]  ;;  %v490_v19 = vpack.i.bf16 %v33_v13, %v32_v12  ;;  %v38_v23 = vld [vmem:[%s737_s0 + $0x4] sm:$0xff] }
   0x6   :  { %v500_v16 = vld [vmem:[%s738_s1 + $0x38] sm:$0xff]   ;;  %v495_v20 = vpack.i.bf16 %v37_v17, %v36_v14  ;;  %v503_v22 = vld [vmem:[%s738_s1 + $0x20] sm:$0xff]   ;;  %v39_v24 = vld [vmem:[%s737_s0 + $0xc] sm:$0xff] }
   0x7   :  { %201 = vmatpush1.bf16.msra.mxu0 %v500_v16  ;;  %v106_v25 = vpack.c.bf16 %v39_v24, %v38_v23 }
   0x8   :  { %476 = vrot.lane.b32.xlu0 %v475_v11, %s535_s23  ;;  %202 = vmatprep.subr.bf16.mxu0 %v532_v7 }
   0x9   :  { %486 = vrot.lane.b32.xlu1 %v485_v15, %s533_s9 }
   0xb   :  { %203 = vmatpush1.bf16.msra.mxu0 %v501_v18 }
   0xc   :  { %491 = vrot.lane.b32.xlu0 %v490_v19, %s535_s23  ;;  %204 = vmatprep.subr.bf16.mxu0 %v532_v7 }
   0xd   :  { %496 = vrot.lane.b32.xlu1 %v495_v20, %s534_s16 }
   0xf   :  { %205 = vmatpush1.bf16.msra.mxu0 %v502_v21 }
  0x10   :  { %206 = vmatprep.subr.bf16.mxu0 %v532_v7 }
  0x11   :  { %10 = vsyncpa [#allocation3], 0  ;;  %v504_v26 = vld [vmem:[%s738_s1 + $0x18] sm:$0xff]   ;;  %406 = vmatprep.mubr.msk.bf16.mxu0 %vm90_vm0, %v106_v25  ;;  %v505_v27 = vld [vmem:[%s738_s1 + $0x10] sm:$0xff]   ;;  %vm95_vm1 = vcmask 523264   ;;  %vm100_vm2 = vcmask 785408   ;;  %v253_v24 = vlaneseq }
  0x12   :  { %v506_v28 = vld [vmem:[%s738_s1 + $0x8] sm:$0xff]   ;;  %v507_v29 = vld [vmem:[%s738_s1] sm:$0xff]   ;;  %v40_v41 = vld [vmem:[%s737_s0 + $0x14] sm:$0xff]  ;;  %vm537_vm3 = vmmov 0   ;;  %vm307_vm6 = vcmask 1041409   ;;  %s538_s13 = smov [#allocation2]  }
  0x13   :  { %207 = vmatpush1.bf16.msra.mxu0 %v503_v22  ;;  %v508_v30 = vld [vmem:[%s738_s1 + $0x48] sm:$0xff]   ;;  %v509_v31 = vld [vmem:[%s738_s1 + $0x40] sm:$0xff]   ;;  %v24_v46 = vld [vmem:[%s737_s0 + $0x10] sm:$0xff]  ;;  %s387_s14 = sshll.u32 %s538_s13, 4  ;;  %s388_s14 = int_to_ptr.vmem [resolvable:$true] %s387_s14 }
  0x14   :  { %208 = vmatprep.subr.bf16.mxu0 %v532_v7  ;;  %v22_v36 = vld [vmem:[%s737_s0] sm:$0xff]  ;;  %v23_v37 = vld [vmem:[%s737_s0 + $0x8] sm:$0xff]  ;;  %v25_v47 = vld [vmem:[%s737_s0 + $0x18] sm:$0xff]  ;;  %s510_s15 = scalar_lea.vmem %s388_s14, 32  ;;  %p515_p1 = scmp.lt.s32.totalorder %s388_s14, %s388_s14 }
  0x15   :  { %v41_v42 = vld [vmem:[%s737_s0 + $0x1c] sm:$0xff]  ;;  %v296_v9 = vld [vmem:[%s740_s3 + $0x70] sm:$0xff]  ;;  %v295_v10 = vld [vmem:[%s740_s3 + $0x68] sm:$0xff]  ;;  %p511_p0 = scmp.ne.s32.totalorder %s388_s14, %s510_s15  ;;  %p516_p2 = scmp.lt.s32.totalorder %s510_s15, %s510_s15 }
  0x16   :  { %v108_v54 = vpack.c.bf16 %v41_v42, %v40_v41  ;;  %v297_v8 = vld [vmem:[%s740_s3 + $0x78] sm:$0xff]  ;;  %v294_v11 = vld [vmem:[%s740_s3 + $0x60] sm:$0xff]  ;;  %v292_v13 = vld [vmem:[%s740_s3 + $0x50] sm:$0xff] }
  0x17   :  { %209 = vmatpush1.bf16.msra.mxu0 %v504_v26  ;;  %v293_v12 = vld [vmem:[%s740_s3 + $0x58] sm:$0xff]  ;;  %v291_v14 = vld [vmem:[%s740_s3 + $0x48] sm:$0xff]  ;;  %v290_v15 = vld [vmem:[%s740_s3 + $0x40] sm:$0xff]  ;;  %v254_v26 = vshrl.u32 %v253_v24, 7  ;;  %p517_p3 = por %p516_p2, %p515_p1 }
  0x18   :  { %210 = vmatprep.subr.bf16.mxu0 %v532_v7  ;;  %v289_v16 = vld [vmem:[%s740_s3 + $0x38] sm:$0xff]  ;;  %v288_v17 = vld [vmem:[%s740_s3 + $0x30] sm:$0xff]  ;;  %v287_v18 = vld [vmem:[%s740_s3 + $0x28] sm:$0xff] }
  0x19   :  { %v286_v19 = vld [vmem:[%s740_s3 + $0x20] sm:$0xff]  ;;  %v285_v20 = vld [vmem:[%s740_s3 + $0x18] sm:$0xff]  ;;  %v284_v21 = vld [vmem:[%s740_s3 + $0x10] sm:$0xff]  ;;  %p518_p4 = pnand %p517_p3, %p511_p0 }
  0x1a   :  { %v283_v22 = vld [vmem:[%s740_s3 + $0x8] sm:$0xff]  ;;  %v282_v23 = vld [vmem:[%s740_s3] sm:$0xff] }
  0x1b   :  { %211 = vmatpush1.bf16.msra.mxu0 %v505_v27  ;;  %v256_v25 = vld [vmem:[%s739_s2 + $0x1] sm:$0x1] }
  0x1c   :  { %212 = vmatprep.subr.bf16.mxu0 %v532_v7  ;;  %v461_v27 = vtrunc.f32 %v256_v25 }
  0x1f   :  { %213 = vmatpush1.bf16.msra.mxu0 %v506_v28  ;;  %v395_v28 = vld [vmem:[%s739_s2] ss:$0 sm:$0xff] }
  0x20   :  { %214 = vmatprep.subr.bf16.mxu0 %v532_v7 }
  0x23   :  { %215 = vmatpush1.bf16.msra.mxu0 %v507_v29  ;;  %v462_v29 = vcvt.f32.s32 %v461_v27 }
  0x24   :  { %228 = vmatprep.subr.bf16.mxu0 %v532_v7 }
  0x27   :  { %229 = vmatpush2.bf16.msra.mxu0 %v508_v30  ;;  %v260_v30 = vsub.s32 0, %v254_v26 }
  0x28   :  { %230 = vmatprep.subr.bf16.mxu0 %v532_v7  ;;  %v536_v7 = vmov 0.0  }
  0x29   :  { %426 = vmatprep.subr.mxu1 %v536_v7  ;;  %458 = vmatprep.mubr.msk.f32.mxu1 %vm537_vm3, %v536_v7 }
  0x2a   :  { %427 = vmatpush3.msra.mxu1 %v297_v8 }
  0x2b   :  { %231 = vmatpush2.bf16.msra.mxu0 %v509_v31  ;;  %428 = vmatprep.subr.mxu1 %v536_v7 }
  0x2c   :  { %429 = vmatpush3.msra.mxu1 %v296_v9 }
  0x2d   :  { %430 = vmatprep.subr.mxu1 %v536_v7 }
  0x2e   :  { %431 = vmatpush3.msra.mxu1 %v295_v10 }
  0x2f   :  { %432 = vmatprep.subr.mxu1 %v536_v7 }
  0x30   :  { %433 = vmatpush3.msra.mxu1 %v294_v11 }
  0x31   :  { %434 = vmatprep.subr.mxu1 %v536_v7 }
  0x32   :  { %435 = vmatpush3.msra.mxu1 %v293_v12 }
  0x33   :  { %436 = vmatprep.subr.mxu1 %v536_v7 }
  0x34   :  { %437 = vmatpush3.msra.mxu1 %v292_v13 }
  0x35   :  { %438 = vmatprep.subr.mxu1 %v536_v7 }
  0x36   :  { %439 = vmatpush3.msra.mxu1 %v291_v14 }
  0x37   :  { %440 = vmatprep.subr.mxu1 %v536_v7 }
  0x38   :  { %441 = vmatpush3.msra.mxu1 %v290_v15 }
  0x39   :  { %442 = vmatprep.subr.mxu1 %v536_v7 }
  0x3a   :  { %443 = vmatpush3.msra.mxu1 %v289_v16 }
  0x3b   :  { %444 = vmatprep.subr.mxu1 %v536_v7 }
  0x3c   :  { %445 = vmatpush3.msra.mxu1 %v288_v17 }
  0x3d   :  { %446 = vmatprep.subr.mxu1 %v536_v7 }
  0x3e   :  { %447 = vmatpush3.msra.mxu1 %v287_v18 }
  0x3f   :  { %448 = vmatprep.subr.mxu1 %v536_v7 }
  0x40   :  { %449 = vmatpush3.msra.mxu1 %v286_v19 }
  0x41   :  { %450 = vmatprep.subr.mxu1 %v536_v7 }
  0x42   :  { %451 = vmatpush3.msra.mxu1 %v285_v20 }
  0x43   :  { %452 = vmatprep.subr.mxu1 %v536_v7 }
  0x44   :  { %453 = vmatpush3.msra.mxu1 %v284_v21 }
  0x45   :  { %454 = vmatprep.subr.mxu1 %v536_v7 }
  0x46   :  { %455 = vmatpush3.msra.mxu1 %v283_v22 }
  0x47   :  { %456 = vmatprep.subr.mxu1 %v536_v7 }
  0x48   :  { %457 = vmatpush3.msra.mxu1 %v282_v23 }
  0x76   :  { %v472_v32 = vpop.permute.xlu0 %471 }
  0x77   :  { %v482_v33 = vpop.permute.xlu1 %481  ;;  %v474_v34 = vunpack.i.h.bf16 %v472_v32  ;;  %v473_v35 = vunpack.i.l.bf16 %v472_v32 }
  0x78   :  { %v484_v38 = vunpack.i.h.bf16 %v482_v33  ;;  %v483_v39 = vunpack.i.l.bf16 %v482_v33  ;;  %v261_v33 = vrot.slane %v462_v29, %v260_v30 }
  0x79   :  { %v91_v48 = vsel %vm90_vm0, %v22_v36, %v473_v35  ;;  %v92_v49 = vsel %vm90_vm0, %v23_v37, %v474_v34  ;;  %v255_v35 = vadd.s32 8, %v254_v26 }
  0x7a   :  { %v477_v40 = vpop.permute.xlu0 %476  ;;  %vm262_vm4 = vcmp.lt.s32.totalorder %v254_v26, %v261_v33 }
  0x7b   :  { %v479_v43 = vunpack.i.h.bf16 %v477_v40  ;;  %v478_v44 = vunpack.i.l.bf16 %v477_v40  ;;  %v487_v45 = vpop.permute.xlu1 %486  ;;  %vm263_vm5 = vcmp.lt.s32.totalorder %v255_v35, %v261_v33 }
  0x7c   :  { %v489_v50 = vunpack.i.h.bf16 %v487_v45  ;;  %v488_v51 = vunpack.i.l.bf16 %v487_v45 }
  0x7d   :  { %v96_v52 = vsel %vm95_vm1, %v91_v48, %v478_v44  ;;  %v97_v53 = vsel %vm95_vm1, %v92_v49, %v479_v43 }
  0x7e   :  { %v93_v55 = vsel %vm90_vm0, %v24_v46, %v488_v51  ;;  %v94_v56 = vsel %vm90_vm0, %v25_v47, %v489_v50  ;;  %v492_v57 = vpop.permute.xlu0 %491  ;;  %v101_v58 = vsel %vm100_vm2, %v96_v52, %v483_v39  ;;  %v102_v59 = vsel %vm100_vm2, %v97_v53, %v484_v38 }
  0x7f   :  { %v494_v60 = vunpack.i.h.bf16 %v492_v57  ;;  %v493_v61 = vunpack.i.l.bf16 %v492_v57  ;;  %v497_v62 = vpop.permute.xlu1 %496  ;;  %v105_v63 = vpack.c.bf16 %v102_v59, %v101_v58 }
  0x80   :  { %v499_v0 = vunpack.i.h.bf16 %v497_v62  ;;  %v498_v1 = vunpack.i.l.bf16 %v497_v62 }
  0x81   :  { %v98_v2 = vsel %vm95_vm1, %v93_v55, %v493_v61  ;;  %v99_v3 = vsel %vm95_vm1, %v94_v56, %v494_v60  ;;  %233 = vmatmul.mubr.bf16.vlgmr.msra.gmra.mxu0 %v105_v63 }
  0x82   :  { %407 = vmatprep.mubr.msk.bf16.mxu0 %vm90_vm0, %v108_v54  ;;  %v103_v4 = vsel %vm100_vm2, %v98_v2, %v498_v1  ;;  %v104_v5 = vsel %vm100_vm2, %v99_v3, %v499_v0 }
  0x83   :  { %v107_v6 = vpack.c.bf16 %v104_v5, %v103_v4  ;;  %v408_v4 = vld [vmem:[%s741_s4] ss:$0 sm:$0xff] }
  0x89   :  { %241 = vmatmul.mubr.bf16.gmra.mxu0 %v107_v6 }
 0x141   :  { %v234_v31 = vpop.f32.mrf.mxu0 }
 0x142   :  { %v235_v32 = vadd.f32 %v395_v28, %v234_v31 }
 0x143   :  { %v236_v34 = vpop.f32.mrf.mxu0 }
 0x144   :  { %v249_v37 = vmax.f32 %v235_v32, 0.0 }
 0x145   :  { %v237_v36 = vpop.f32.mrf.mxu0 }
 0x146   :  { %v238_v38 = vadd.f32 %v395_v28, %v237_v36  ;;  %v264_v42 = vsel %vm262_vm4, %v249_v37, 0.0 }
 0x147   :  { %v239_v39 = vpop.f32.mrf.mxu0 }
 0x148   :  { %v250_v40 = vmax.f32 %v238_v38, 0.0 }
 0x149   :  { %v242_v41 = vpop.f32.mrf.mxu0 }
 0x14a   :  { %v265_v43 = vsel %vm263_vm5, %v250_v40, 0.0  ;;  %v243_v44 = vadd.f32 %v395_v28, %v242_v41 }
 0x14b   :  { %v268_v45 = vmax.f32 %v264_v42, %v265_v43  ;;  %v244_v46 = vpop.f32.mrf.mxu0 }
 0x14c   :  { %v251_v49 = vmax.f32 %v243_v44, 0.0 }
 0x14d   :  { %v269_v47 = vrot.slane %v268_v45, 4  ;;  %v245_v48 = vpop.f32.mrf.mxu0 }
 0x14e   :  { %v246_v50 = vadd.f32 %v395_v28, %v245_v48  ;;  %v266_v54 = vsel %vm262_vm4, %v251_v49, 0.0 }
 0x14f   :  { %v270_v51 = vmax.f32 %v268_v45, %v269_v47  ;;  %v247_v52 = vpop.f32.mrf.mxu0 }
 0x150   :  { %v252_v53 = vmax.f32 %v246_v50, 0.0 }
 0x151   :  { %v271_v56 = vrot.slane %v270_v51, 2 }
 0x152   :  { %v267_v55 = vsel %vm263_vm5, %v252_v53, 0.0 }
 0x153   :  { %v275_v57 = vmax.f32 %v266_v54, %v267_v55  ;;  %v272_v59 = vmax.f32 %v270_v51, %v271_v56 }
 0x155   :  { %v276_v58 = vrot.slane %v275_v57, 4  ;;  %v273_v63 = vrot.slane %v272_v59, 1 }
 0x157   :  { %v277_v60 = vmax.f32 %v275_v57, %v276_v58  ;;  %v274_v1 = vmax.f32 %v272_v59, %v273_v63 }
 0x159   :  { %v278_v61 = vrot.slane %v277_v60, 2 }
 0x15b   :  { %v279_v62 = vmax.f32 %v277_v60, %v278_v61 }
 0x15d   :  { %v280_v0 = vrot.slane %v279_v62, 1 }
 0x15f   :  { %v281_v2 = vmax.f32 %v279_v62, %v280_v0 }
 0x161   :  { %v308_v3 = vsel %vm307_vm6, %v281_v2, %v274_v1 }
 0x162   :  { %459 = vmatmul.mubr.f32.vlgmr.msra.gmra.mxu1 %v308_v3 }
 0x222   :  { %v376_v5 = vpop.f32.mrf.mxu1 }
 0x223   :  { %v377_v6 = vadd.f32 %v408_v4, %v376_v5 }
 0x224   :  { %v460_v7 = vpop.f32.mrf.mxu1 }
 0x225   :  { %380 = vst [vmem:[#allocation2] sm:$0x3] %v377_v6 }
 0x226   :  { %521 = shalt.err (!%p518_p4)
}
 0x227   :  { %390 = dma.vmem_to_hbm [thread:$0]  %s388_s14, 32, %s742_s5, [#allocation3]  }
 0x228   :  { %530 = dma.done.wait [#allocation3], 32  }
 0x229   :  { %531 = vsyncadd [#allocation3], 4294967264 }
 0x22a   :  { %394 = vsyncpa [#allocation3], 1 }

</bundles_post_ra>
